<compile_context>
chip_gen: v7x
topology: tpu7x:2x2x1
jax: 0.10.0
libtpu: 0.0.40
codegen_flags: <defaults>
</compile_context>

<pallas_src>
import jax
import jax.numpy as jnp
from jax import lax
from jax.experimental import pallas as pl
from jax.experimental.pallas import tpu as pltpu


DEFAULT_TB = 512  # batch rows per grid step


def ratio_net_kernel(x_ref,
                     w1_ref, b1_ref,
                     w2_ref, b2_ref,
                     w3_ref, b3_ref,
                     w4_ref, b4_ref,
                     o_ref):
    cd = w1_ref.dtype  # MXU input dtype (bf16 by default)
    # Cast the streamed x tile in-kernel (saves a whole wrapper pass over x in HBM).
    x = x_ref[...].astype(cd)
    # Layer 1: (TB,4) @ (4,32) on the MXU, f32 accumulate; bias + ReLU in f32.
    h = jnp.dot(x, w1_ref[...], preferred_element_type=jnp.float32)
    h = jnp.maximum(h + b1_ref[...], 0.0)
    # Layer 2: (TB,32) @ (32,64).
    h = jnp.dot(h.astype(cd), w2_ref[...], preferred_element_type=jnp.float32)
    h = jnp.maximum(h + b2_ref[...], 0.0)
    # Layer 3: (TB,64) @ (64,128).
    h = jnp.dot(h.astype(cd), w3_ref[...], preferred_element_type=jnp.float32)
    h = jnp.maximum(h + b3_ref[...], 0.0)
    # Output layer (128 -> 1): VPU multiply + XLU lane reduction, all f32 (v5e-safe).
    out = jnp.sum(h * w4_ref[...], axis=-1, keepdims=True) + b4_ref[...]
    o_ref[...] = out.astype(o_ref.dtype)


def ratio_net_forward(x, params, *, compute_dtype=jnp.bfloat16, tb=DEFAULT_TB):
    """x: (B, 4) float32. Returns (B, 1) float32."""
    B, f_in = x.shape
    assert f_in == 4

    # Adaptive tile: shrink to the (8-rounded) batch for tiny inputs, cap at `tb`.
    b8 = ((B + 7) // 8) * 8
    tb = max(8, min(tb, b8))
    num_tiles = pl.cdiv(B, tb)
    bp = num_tiles * tb
    if bp != B:
        x = jnp.pad(x, ((0, bp - B), (0, 0)))

    # Weights in compute_dtype for the MXU; biases / w4 stay f32 (accumulator math).
    w1 = params["w1"].astype(compute_dtype)
    w2 = params["w2"].astype(compute_dtype)
    w3 = params["w3"].astype(compute_dtype)
    b1 = params["b1"].astype(jnp.float32)
    b2 = params["b2"].astype(jnp.float32)
    b3 = params["b3"].astype(jnp.float32)
    # w4 as a lane-dense (1, 128) row for the VPU/XLU reduction.
    w4 = params["w4"].reshape(1, 128).astype(jnp.float32)
    b4 = params["b4"].reshape(1, 1).astype(jnp.float32)

    # Explicit per-array BlockSpecs. x / out stream over the batch grid axis;
    # weights & biases use constant block indices -> fetched once, VMEM-resident.
    in_specs = [
        pl.BlockSpec((tb, 4),   lambda i: (i, 0)),   # x (streamed, cast in-kernel)
        pl.BlockSpec((4, 32),   lambda i: (0, 0)),   # w1
        pl.BlockSpec((1, 32),   lambda i: (0, 0)),   # b1
        pl.BlockSpec((32, 64),  lambda i: (0, 0)),   # w2
        pl.BlockSpec((1, 64),   lambda i: (0, 0)),   # b2
        pl.BlockSpec((64, 128), lambda i: (0, 0)),   # w3
        pl.BlockSpec((1, 128),  lambda i: (0, 0)),   # b3
        pl.BlockSpec((1, 128),  lambda i: (0, 0)),   # w4 row
        pl.BlockSpec((1, 1),    lambda i: (0, 0)),   # b4
    ]
    out_spec = pl.BlockSpec((tb, 1), lambda i: (i, 0))

    out = pl.pallas_call(
        ratio_net_kernel,
        out_shape=jax.ShapeDtypeStruct((bp, 1), jnp.float32),
        grid=(num_tiles,),
        in_specs=in_specs,
        out_specs=out_spec,
        compiler_params=pltpu.CompilerParams(
            dimension_semantics=("parallel",)),
    )(x, w1, b1, w2, b2, w3, b3, w4, b4)
    return out[:B]


def init_params(key):
    """Deterministic init mimicking nn.Linear default (uniform +-1/sqrt(fan_in)).
    Weights stored as (in_features, out_features); biases as (1, out_features)."""
    dims = [(4, 32), (32, 64), (64, 128), (128, 1)]
    params = {}
    keys = jax.random.split(key, 2 * len(dims))
    for i, (fan_in, fan_out) in enumerate(dims):
        bound = 1.0 / jnp.sqrt(float(fan_in))
        w = jax.random.uniform(keys[2 * i], (fan_in, fan_out),
                               minval=-bound, maxval=bound, dtype=jnp.float32)
        b = jax.random.uniform(keys[2 * i + 1], (1, fan_out),
                               minval=-bound, maxval=bound, dtype=jnp.float32)
        params[f"w{i + 1}"] = w
        params[f"b{i + 1}"] = b
    return params


def ratio_net_reference(x, params, compute_dtype=jnp.float32):
    """Pure-JAX reference. compute_dtype=bf16 mirrors the kernel's MXU precision."""
    cd = compute_dtype
    h = x
    for i in (1, 2, 3):
        h = jnp.dot(h.astype(cd), params[f"w{i}"].astype(cd),
                    preferred_element_type=jnp.float32,
                    precision=lax.Precision.HIGHEST) + params[f"b{i}"]
        h = jnp.maximum(h, 0.0)
    return jnp.dot(h, params["w4"], preferred_element_type=jnp.float32,
                   precision=lax.Precision.HIGHEST) + params["b4"]


if __name__ == "__main__":
    key = jax.random.PRNGKey(0)
    k_params, k_x = jax.random.split(key)
    params = init_params(k_params)

    B = 8
    x = jax.random.normal(k_x, (B, 4), dtype=jnp.float32)

    fwd = jax.jit(ratio_net_forward)
    out = jax.block_until_ready(fwd(x, params))
    assert out.shape == (B, 1)

    # Check against a reference mirroring the kernel precision (bf16 MXU inputs,
    # f32 accumulation / f32 output layer): should match tightly.
    ref_mirror = ratio_net_reference(x, params, compute_dtype=jnp.bfloat16)
    assert jnp.allclose(out, ref_mirror, atol=2e-3, rtol=2e-3), (
        jnp.max(jnp.abs(out - ref_mirror)))

    # Sanity check against the pure-f32 PyTorch-equivalent forward.
    ref_f32 = ratio_net_reference(x, params, compute_dtype=jnp.float32)
    assert jnp.allclose(out, ref_f32, atol=5e-2, rtol=5e-2), (
        jnp.max(jnp.abs(out - ref_f32)))

    print("KERNEL_OK")
</pallas_src>

<mosaic_0001>
module attributes {stable_mosaic.version = 11 : i64} {
  func.func @ratio_net_kernel(%arg0: i32, %arg1: memref<8x4xf32, #tpu.memory_space<vmem>>, %arg2: memref<4x32xbf16, #tpu.memory_space<vmem>>, %arg3: memref<1x32xf32, #tpu.memory_space<vmem>>, %arg4: memref<32x64xbf16, #tpu.memory_space<vmem>>, %arg5: memref<1x64xf32, #tpu.memory_space<vmem>>, %arg6: memref<64x128xbf16, #tpu.memory_space<vmem>>, %arg7: memref<1x128xf32, #tpu.memory_space<vmem>>, %arg8: memref<1x128xf32, #tpu.memory_space<vmem>>, %arg9: memref<1x1xf32, #tpu.memory_space<vmem>>, %arg10: memref<8x1xf32, #tpu.memory_space<vmem>>) attributes {dimension_semantics = [#tpu.dimension_semantics<parallel>], iteration_bounds = array<i64: 1>, scalar_prefetch = 0 : i64, scratch_operands = 0 : i64, tpu.core_type = #tpu.core_type<tc>, window_params = [{transform_indices = @transform_0, window_bounds = array<i64: 8, 4>}, {pipeline_mode = #tpu.pipeline_mode<synchronous>, transform_indices = @transform_1, window_bounds = array<i64: 4, 32>}, {pipeline_mode = #tpu.pipeline_mode<synchronous>, transform_indices = @transform_2, window_bounds = array<i64: 1, 32>}, {pipeline_mode = #tpu.pipeline_mode<synchronous>, transform_indices = @transform_3, window_bounds = array<i64: 32, 64>}, {pipeline_mode = #tpu.pipeline_mode<synchronous>, transform_indices = @transform_4, window_bounds = array<i64: 1, 64>}, {pipeline_mode = #tpu.pipeline_mode<synchronous>, transform_indices = @transform_5, window_bounds = array<i64: 64, 128>}, {pipeline_mode = #tpu.pipeline_mode<synchronous>, transform_indices = @transform_6, window_bounds = array<i64: 1, 128>}, {pipeline_mode = #tpu.pipeline_mode<synchronous>, transform_indices = @transform_7, window_bounds = array<i64: 1, 128>}, {pipeline_mode = #tpu.pipeline_mode<synchronous>, transform_indices = @transform_8, window_bounds = array<i64: 1, 1>}, {transform_indices = @transform_9, window_bounds = array<i64: 8, 1>}]} {
    %c0 = arith.constant 0 : index
    %c0_0 = arith.constant 0 : index
    %0 = vector.load %arg1[%c0, %c0_0] : memref<8x4xf32, #tpu.memory_space<vmem>>, vector<8x4xf32>
    %1 = arith.truncf %0 : vector<8x4xf32> to vector<8x4xbf16>
    %c0_1 = arith.constant 0 : index
    %c0_2 = arith.constant 0 : index
    %2 = vector.load %arg2[%c0_1, %c0_2] : memref<4x32xbf16, #tpu.memory_space<vmem>>, vector<4x32xbf16>
    %cst = arith.constant dense<0.000000e+00> : vector<8x32xf32>
    %3 = tpu.matmul %1, %2, %cst {dimension_numbers = #tpu.dot_dimension_numbers<[1], [0], [0], [1], [0, 0, 1, 1], [], []>} : vector<8x4xbf16>, vector<4x32xbf16>, vector<8x32xf32> -> vector<8x32xf32>
    %c0_3 = arith.constant 0 : index
    %c0_4 = arith.constant 0 : index
    %4 = vector.load %arg3[%c0_3, %c0_4] : memref<1x32xf32, #tpu.memory_space<vmem>>, vector<1x32xf32>
    %5 = vector.broadcast %4 : vector<1x32xf32> to vector<8x32xf32>
    %6 = arith.addf %3, %5 : vector<8x32xf32>
    %cst_5 = arith.constant 0.000000e+00 : f32
    %7 = vector.broadcast %cst_5 : f32 to vector<8x32xf32>
    %8 = arith.maximumf %6, %7 : vector<8x32xf32>
    %9 = arith.truncf %8 : vector<8x32xf32> to vector<8x32xbf16>
    %c0_6 = arith.constant 0 : index
    %c0_7 = arith.constant 0 : index
    %10 = vector.load %arg4[%c0_6, %c0_7] : memref<32x64xbf16, #tpu.memory_space<vmem>>, vector<32x64xbf16>
    %cst_8 = arith.constant dense<0.000000e+00> : vector<8x64xf32>
    %11 = tpu.matmul %9, %10, %cst_8 {dimension_numbers = #tpu.dot_dimension_numbers<[1], [0], [0], [1], [0, 0, 1, 1], [], []>} : vector<8x32xbf16>, vector<32x64xbf16>, vector<8x64xf32> -> vector<8x64xf32>
    %c0_9 = arith.constant 0 : index
    %c0_10 = arith.constant 0 : index
    %12 = vector.load %arg5[%c0_9, %c0_10] : memref<1x64xf32, #tpu.memory_space<vmem>>, vector<1x64xf32>
    %13 = vector.broadcast %12 : vector<1x64xf32> to vector<8x64xf32>
    %14 = arith.addf %11, %13 : vector<8x64xf32>
    %cst_11 = arith.constant 0.000000e+00 : f32
    %15 = vector.broadcast %cst_11 : f32 to vector<8x64xf32>
    %16 = arith.maximumf %14, %15 : vector<8x64xf32>
    %17 = arith.truncf %16 : vector<8x64xf32> to vector<8x64xbf16>
    %c0_12 = arith.constant 0 : index
    %c0_13 = arith.constant 0 : index
    %18 = vector.load %arg6[%c0_12, %c0_13] : memref<64x128xbf16, #tpu.memory_space<vmem>>, vector<64x128xbf16>
    %cst_14 = arith.constant dense<0.000000e+00> : vector<8x128xf32>
    %19 = tpu.matmul %17, %18, %cst_14 {dimension_numbers = #tpu.dot_dimension_numbers<[1], [0], [0], [1], [0, 0, 1, 1], [], []>} : vector<8x64xbf16>, vector<64x128xbf16>, vector<8x128xf32> -> vector<8x128xf32>
    %c0_15 = arith.constant 0 : index
    %c0_16 = arith.constant 0 : index
    %20 = vector.load %arg7[%c0_15, %c0_16] : memref<1x128xf32, #tpu.memory_space<vmem>>, vector<1x128xf32>
    %21 = vector.broadcast %20 : vector<1x128xf32> to vector<8x128xf32>
    %22 = arith.addf %19, %21 : vector<8x128xf32>
    %cst_17 = arith.constant 0.000000e+00 : f32
    %23 = vector.broadcast %cst_17 : f32 to vector<8x128xf32>
    %24 = arith.maximumf %22, %23 : vector<8x128xf32>
    %c0_18 = arith.constant 0 : index
    %c0_19 = arith.constant 0 : index
    %25 = vector.load %arg8[%c0_18, %c0_19] : memref<1x128xf32, #tpu.memory_space<vmem>>, vector<1x128xf32>
    %26 = vector.broadcast %25 : vector<1x128xf32> to vector<8x128xf32>
    %27 = arith.mulf %24, %26 : vector<8x128xf32>
    %cst_20 = arith.constant dense<0.000000e+00> : vector<8xf32>
    %28 = vector.multi_reduction <add>, %27, %cst_20 [1] : vector<8x128xf32> to vector<8xf32>
    %29 = vector.shape_cast %28 : vector<8xf32> to vector<8x1xf32>
    %c0_21 = arith.constant 0 : index
    %c0_22 = arith.constant 0 : index
    %30 = vector.load %arg9[%c0_21, %c0_22] : memref<1x1xf32, #tpu.memory_space<vmem>>, vector<1x1xf32>
    %31 = vector.broadcast %30 : vector<1x1xf32> to vector<8x1xf32>
    %32 = arith.addf %29, %31 : vector<8x1xf32>
    %c0_23 = arith.constant 0 : index
    %c0_24 = arith.constant 0 : index
    %33 = vector.load %arg10[%c0_23, %c0_24] : memref<8x1xf32, #tpu.memory_space<vmem>>, vector<8x1xf32>
    tpu.vector_store %arg10[%c0_23, %c0_24], %32 {strides = array<i32>} : memref<8x1xf32, #tpu.memory_space<vmem>>, vector<8x1xf32>,
    return
  }
  func.func @transform_0(%arg0: i32) -> (i32, i32) {
    %c0_i32 = arith.constant 0 : i32
    %c0_i32_0 = arith.constant 0 : i32
    return %arg0, %c0_i32 : i32, i32
  }
  func.func @transform_1(%arg0: i32) -> (i32, i32) {
    %c0_i32 = arith.constant 0 : i32
    %c0_i32_0 = arith.constant 0 : i32
    %c0_i32_1 = arith.constant 0 : i32
    return %c0_i32, %c0_i32_0 : i32, i32
  }
  func.func @transform_2(%arg0: i32) -> (i32, i32) {
    %c0_i32 = arith.constant 0 : i32
    %c0_i32_0 = arith.constant 0 : i32
    %c0_i32_1 = arith.constant 0 : i32
    return %c0_i32, %c0_i32_0 : i32, i32
  }
  func.func @transform_3(%arg0: i32) -> (i32, i32) {
    %c0_i32 = arith.constant 0 : i32
    %c0_i32_0 = arith.constant 0 : i32
    %c0_i32_1 = arith.constant 0 : i32
    return %c0_i32, %c0_i32_0 : i32, i32
  }
  func.func @transform_4(%arg0: i32) -> (i32, i32) {
    %c0_i32 = arith.constant 0 : i32
    %c0_i32_0 = arith.constant 0 : i32
    %c0_i32_1 = arith.constant 0 : i32
    return %c0_i32, %c0_i32_0 : i32, i32
  }
  func.func @transform_5(%arg0: i32) -> (i32, i32) {
    %c0_i32 = arith.constant 0 : i32
    %c0_i32_0 = arith.constant 0 : i32
    %c0_i32_1 = arith.constant 0 : i32
    return %c0_i32, %c0_i32_0 : i32, i32
  }
  func.func @transform_6(%arg0: i32) -> (i32, i32) {
    %c0_i32 = arith.constant 0 : i32
    %c0_i32_0 = arith.constant 0 : i32
    %c0_i32_1 = arith.constant 0 : i32
    return %c0_i32, %c0_i32_0 : i32, i32
  }
  func.func @transform_7(%arg0: i32) -> (i32, i32) {
    %c0_i32 = arith.constant 0 : i32
    %c0_i32_0 = arith.constant 0 : i32
    %c0_i32_1 = arith.constant 0 : i32
    return %c0_i32, %c0_i32_0 : i32, i32
  }
  func.func @transform_8(%arg0: i32) -> (i32, i32) {
    %c0_i32 = arith.constant 0 : i32
    %c0_i32_0 = arith.constant 0 : i32
    %c0_i32_1 = arith.constant 0 : i32
    return %c0_i32, %c0_i32_0 : i32, i32
  }
  func.func @transform_9(%arg0: i32) -> (i32, i32) {
    %c0_i32 = arith.constant 0 : i32
    %c0_i32_0 = arith.constant 0 : i32
    return %arg0, %c0_i32 : i32, i32
  }
}

</mosaic_0001>

<bundles_post_ra>
// kernel: ratio_net_forward.1
= control target key start
LH: loop header
LB: loop body
LE: loop exit
PB: predicated region body
PF: predicated region fallthrough
CT: control target
= control target key end

     0   :  { %vm49_vm0 = vcmask 1041408   ;;  %v330_v0 = vmov 0.0   ;;  %vm331_vm1 = vmmov 0   ;;  %vm45_vm2 = vcmask 31744   ;;  %s424_s1 = inlined_call_operand.vmem [shape: bf16[4,32], index: 1, kind: input, shape index: {}]   ;;  %s425_s0 = inlined_call_operand.vmem [shape: f32[8,4], index: 0, kind: input, shape index: {}]   ;;  %s426_s3 = inlined_call_operand.vmem [shape: bf16[32,64], index: 3, kind: input, shape index: {}]   ;;  %s427_s5 = inlined_call_operand.vmem [shape: bf16[64,128], index: 5, kind: input, shape index: {}]   ;;  %s428_s2 = inlined_call_operand.vmem [shape: f32[1,32], index: 2, kind: input, shape index: {}]   ;;  %s429_s4 = inlined_call_operand.vmem [shape: f32[1,64], index: 4, kind: input, shape index: {}]   ;;  %s430_s8 = inlined_call_operand.<no memory space> [shape: f32[1,1], index: 8, kind: input, shape index: {}]   ;;  %s431_s6 = inlined_call_operand.vmem [shape: f32[1,128], index: 6, kind: input, shape index: {}]   ;;  %s432_s7 = inlined_call_operand.vmem [shape: f32[1,128], index: 7, kind: input, shape index: {}]   ;;  %s433_s9 = inlined_call_operand.vmem [shape: f32[8,1], index: 9, kind: output, shape index: {}]  }
   0x1   :  { %296 = vmatprep.subr.bf16.mxu1 %v330_v0  ;;  %v37_v1 = vld [vmem:[%s424_s1] sm:$0x3]  ;;  %298 = vmatprep.mubr.msk.bf16.mxu1 %vm331_vm1, %v330_v0  ;;  %v325_v6 = vld [vmem:[%s426_s3 + $0x8] sm:$0xff]   ;;  %vm118_vm3 = vcmask 261120   ;;  %v328_v17 = vld [vmem:[%s427_s5 + $0x10] sm:$0xff]   ;;  %vm203_vm4 = vcmask 523264   ;;  %v14_v27 = vstv %s430_s8 }
   0x2   :  { %v35_v2 = vld [vmem:[%s425_s0] sm:$0xff]  ;;  %v51_v3 = vsel %vm49_vm0, %v37_v1, 0  ;;  %310 = vmatprep.subr.bf16.mxu0 %v330_v0  ;;  %318 = vmatprep.mubr.msk.bf16.mxu0 %vm331_vm1, %v330_v0  ;;  %v327_v8 = vld [vmem:[%s427_s5 + $0x8] sm:$0xff]   ;;  %v329_v18 = vld [vmem:[%s427_s5 + $0x18] sm:$0xff]   ;;  %15 = vst [vmem:[#allocation2] sm:$0x1] %v14_v27 }
   0x3   :  { %v36_v4 = vpack.c.bf16 %v35_v2, %v35_v2  ;;  %297 = vmatpush3.bf16.msra.mxu1 %v51_v3  ;;  %v324_v5 = vld [vmem:[%s426_s3] sm:$0xff]   ;;  %vm266_vm5 = vcmask 7168  }
   0x4   :  { %302 = vmatprep.subr.bf16.mxu1 %v330_v0  ;;  %v326_v7 = vld [vmem:[%s427_s5] sm:$0xff]  }
   0x5   :  { %311 = vmatpush3.bf16.msra.mxu0 %v326_v7  ;;  %v272_v9 = vld [vmem:[%s428_s2] ss:$0 sm:$0xff] }
   0x6   :  { %299 = vmatmul.mubr.msk.bf16.vlgmr.msra.gmra.mrb[0].mxu1 %vm45_vm2, %v36_v4  ;;  %312 = vmatprep.subr.bf16.mxu0 %v330_v0  ;;  %v274_v19 = vld [vmem:[%s429_s4] ss:$0 sm:$0xff] }
   0x7   :  { %303 = vmatpush3.bf16.msra.mxu1 %v324_v5  ;;  %306 = vmatprep.mubr.msk.bf16.mxu1 %vm331_vm1, %v330_v0  ;;  %v278_v28 = vld [vmem:[%s431_s6] ss:$0 sm:$0xff] }
   0x8   :  { %304 = vmatprep.subr.bf16.mxu1 %v330_v0  ;;  %v284_v33 = vld [vmem:[%s432_s7] ss:$0 sm:$0xff] }
   0x9   :  { %313 = vmatpush3.bf16.msra.mxu0 %v327_v8  ;;  %v285_v37 = vld [vmem:[#allocation2] ss:$0 sm:$0xff] }
   0xa   :  { %314 = vmatprep.subr.bf16.mxu0 %v330_v0 }
   0xb   :  { %305 = vmatpush3.bf16.msra.mxu1 %v325_v6 }
   0xd   :  { %315 = vmatpush3.bf16.msra.mxu0 %v328_v17 }
   0xe   :  { %316 = vmatprep.subr.bf16.mxu0 %v330_v0 }
  0x11   :  { %317 = vmatpush3.bf16.msra.mxu0 %v329_v18 }
  0xd9   :  { %v87_v10 = vpop.f32.mrb[0].mxu1 }
  0xda   :  { %v88_v11 = vadd.f32 %v272_v9, %v87_v10  ;;  %v300_v12 = vpop.f32.mrb[1].mxu1 }
  0xdb   :  { %v90_v13 = vpop.f32.mrb[2].mxu1 }
  0xdc   :  { %v93_v14 = vmax.f32 %v88_v11, 0.0  ;;  %v301_v15 = vpop.f32.mrb[3].mxu1 }
  0xde   :  { %v94_v16 = vpack.c.bf16 %v93_v14, %v93_v14 }
  0xe0   :  { %307 = vmatmul.mubr.msk.bf16.vlgmr.msra.gmra.mrb[4].mxu1 %vm118_vm3, %v94_v16 }
 0x1b3   :  { %v156_v20 = vpop.f32.mrb[4].mxu1 }
 0x1b4   :  { %v157_v21 = vadd.f32 %v274_v19, %v156_v20  ;;  %v308_v22 = vpop.f32.mrb[5].mxu1 }
 0x1b5   :  { %v159_v23 = vpop.f32.mrb[6].mxu1 }
 0x1b6   :  { %v162_v24 = vmax.f32 %v157_v21, 0.0  ;;  %v309_v25 = vpop.f32.mrb[7].mxu1 }
 0x1b8   :  { %v163_v26 = vpack.c.bf16 %v162_v24, %v162_v24 }
 0x1ba   :  { %319 = vmatmul.mubr.msk.bf16.vlgmr.msra.gmra.mrb[0].mxu0 %vm203_vm4, %v163_v26 }
 0x28d   :  { %v241_v29 = vpop.f32.mrb[0].mxu0 }
 0x28e   :  { %v242_v30 = vadd.f32 %v278_v28, %v241_v29  ;;  %v320_v31 = vpop.f32.mrb[1].mxu0 }
 0x28f   :  { %v244_v32 = vpop.f32.mrb[2].mxu0 }
 0x290   :  { %v247_v34 = vmax.f32 %v242_v30, 0.0  ;;  %v321_v35 = vpop.f32.mrb[3].mxu0 }
 0x292   :  { %v255_v36 = vmul.f32 %v284_v33, %v247_v34 }
 0x294   :  { %256 = vadd.xlane.f32.xlu0 %v255_v36 }
 0x321   :  { %v257_v38 = vpop.xlane.xlu0 %256 }
 0x322   :  { %v265_v39 = vadd.f32 %v285_v37, %v257_v38 }
 0x324   :  { %267 = vst.msk [vmem:[%s433_s9] sm:$0xff] %vm266_vm5, %v265_v39 }

</bundles_post_ra>
